<compile_context>
chip_gen: v6e
topology: v6e:2x2x1
jax: 0.10.0
libtpu: 0.0.40
codegen_flags: <defaults>
</compile_context>

<pallas_src>
from dataclasses import dataclass
from typing import List

import jax
import jax.numpy as jnp
import numpy as np
from jax.experimental import pallas as pl
from jax.experimental.pallas import tpu as pltpu


@dataclass
class Chromosome:
    gene: List[int]
    phenome: float
    length: int = 0

    def __post_init__(self):
        self.length = len(self.gene)


P_TILE = 128        # chromosomes per grid step (lane axis; one vreg lane width).
                    # Population axis is marked "parallel" so >=2 tiles can be
                    # split across v7x's two TensorCores for populations > 128.
N_TILE_CAP = 2048   # max tour positions per grid step (sublane axis).  Keeps the
                    # double-buffered inputs at 2 planes * 2048*128*4B*2 = 4 MiB,
                    # well inside v5e's 16 MiB default scoped VMEM.


def _round_up(x: int, m: int) -> int:
    return (x + m - 1) // m * m


def _tour_fitness_kernel(xs_ref, ys_ref, o_ref,
                         acc_ref, px_ref, py_ref, fx_ref, fy_ref):
    """Closed-tour Euclidean length, tour axis tiled as a reduction.

    xs_ref / ys_ref: (N_TILE, P_TILE) f32 -- x / y coordinate of tour position
        (sublane axis) for each chromosome (lane axis).  Tour positions >= N
        repeat the last real tour point, so padded edges have zero length.
    o_ref: (1, P_TILE) f32 -- tour length per chromosome (lane-dense store).
    acc_ref: running per-chromosome sum; px/py: last tour point of the
        previous tile (carry); fx/fy: first tour point (for the closing edge).
    """
    k = pl.program_id(1)
    last = pl.num_programs(1) - 1

    xs = xs_ref[...]
    ys = ys_ref[...]

    @pl.when(k == 0)
    def _():
        acc_ref[...] = jnp.zeros_like(acc_ref)
        fx_ref[...] = xs[0:1, :]
        fy_ref[...] = ys[0:1, :]

    @pl.when(k > 0)
    def _():
        # Edge from the previous tile's last tour point to this tile's first.
        bx = xs[0:1, :] - px_ref[...]
        by = ys[0:1, :] - py_ref[...]
        acc_ref[...] += jnp.sqrt(bx * bx + by * by)

    # Consecutive edges inside the tile.  Sublane roll by +1 (XLU, ~free):
    # row r then holds position r-1, so rows 1..T-1 are the T-1 consecutive
    # edges; row 0 (the cyclic wrap) is masked out and handled by the carry /
    # explicit closing edge instead.
    xn = pltpu.roll(xs, shift=1, axis=0)
    yn = pltpu.roll(ys, shift=1, axis=0)
    dx = xs - xn
    dy = ys - yn
    edge = jnp.sqrt(dx * dx + dy * dy)                       # EUP sqrt
    row = jax.lax.broadcasted_iota(jnp.int32, edge.shape, 0)
    edge = jnp.where(row > 0, edge, 0.0)
    acc_ref[...] += jnp.sum(edge, axis=0, keepdims=True)     # sublane reduce -> (1, P_TILE)

    # Carry this tile's last tour point for the next tile's boundary edge.
    px_ref[...] = xs[-1:, :]
    py_ref[...] = ys[-1:, :]

    @pl.when(k == last)
    def _():
        # Closing edge: last tour point back to the first one; lane-dense store.
        cx = xs[-1:, :] - fx_ref[...]
        cy = ys[-1:, :] - fy_ref[...]
        o_ref[...] = acc_ref[...] + jnp.sqrt(cx * cx + cy * cy)


def population_tour_length(genes: jax.Array, coords: jax.Array) -> jax.Array:
    """Total closed-tour length per chromosome, computed in a Pallas kernel.

    genes:  (P, N) int32, each row a permutation of range(N)
    coords: (N, 2) float32 city coordinates
    returns (P,) float32 tour lengths
    """
    P, N = genes.shape

    Ppad = _round_up(max(P, 1), P_TILE)
    npad8 = _round_up(max(N, 1), 8)
    if npad8 <= N_TILE_CAP:
        n_tile = npad8
        Npad = npad8
    else:
        n_tile = N_TILE_CAP
        Npad = _round_up(N, N_TILE_CAP)

    # Two separate lane-dense plane gathers in (tour, population) layout:
    # no (P, N, 2) intermediate (trailing dim 2 is lane-sparse on TPU).
    genes_t = genes.T.astype(jnp.int32)                 # (N, P) int32
    cx = coords[:, 0].astype(jnp.float32)
    cy = coords[:, 1].astype(jnp.float32)
    xs = cx[genes_t]                                    # (N, P) f32
    ys = cy[genes_t]

    # Tour-axis padding repeats the last real tour point -> padded edges are
    # zero-length; the closing edge is added explicitly inside the kernel.
    if Npad > N:
        xs = jnp.pad(xs, ((0, Npad - N), (0, 0)), mode="edge")
        ys = jnp.pad(ys, ((0, Npad - N), (0, 0)), mode="edge")
    # Padded chromosomes (lane axis) are all-zero -> fitness 0, sliced off.
    if Ppad > P:
        xs = jnp.pad(xs, ((0, 0), (0, Ppad - P)))
        ys = jnp.pad(ys, ((0, 0), (0, Ppad - P)))

    num_p_tiles = Ppad // P_TILE
    num_n_tiles = Npad // n_tile

    out = pl.pallas_call(
        _tour_fitness_kernel,
        out_shape=jax.ShapeDtypeStruct((1, Ppad), jnp.float32),
        grid=(num_p_tiles, num_n_tiles),
        in_specs=[
            pl.BlockSpec((n_tile, P_TILE), lambda i, k: (k, i)),
            pl.BlockSpec((n_tile, P_TILE), lambda i, k: (k, i)),
        ],
        out_specs=pl.BlockSpec((1, P_TILE), lambda i, k: (0, i)),
        scratch_shapes=[pltpu.VMEM((1, P_TILE), jnp.float32) for _ in range(5)],
        compiler_params=pltpu.CompilerParams(
            dimension_semantics=("parallel", "arbitrary")),
    )(xs, ys)
    return out[0, :P]


def _swap_mutation(genes: jax.Array, key: jax.Array) -> jax.Array:
    """One random swap of two distinct positions per chromosome (fused select)."""
    P, N = genes.shape
    ki, kj = jax.random.split(key)
    i = jax.random.randint(ki, (P,), 0, N)
    off = jax.random.randint(kj, (P,), 1, max(N, 2))    # 1..N-1 => i != j (no-op if N == 1)
    j = (i + off) % N
    rows = jnp.arange(P)
    gi = genes[rows, i]
    gj = genes[rows, j]
    col = jnp.arange(N, dtype=genes.dtype)[None, :]
    # Single elementwise select pass instead of two chained (P, N) scatters.
    return jnp.where(col == i[:, None], gj[:, None],
                     jnp.where(col == j[:, None], gi[:, None], genes))


@jax.jit
def mutate_population(genes: jax.Array, coords: jax.Array, key: jax.Array):
    """Mutate.forward over a whole population: swap mutation + fitness re-eval."""
    new_genes = _swap_mutation(genes, key)
    fitness = population_tour_length(new_genes, coords)
    return new_genes, fitness


if __name__ == "__main__":
    key = jax.random.PRNGKey(0)
    k_coords, k_pop, k_mut = jax.random.split(key, 3)

    n_cities = 16
    pop_size = 8
    coords = jax.random.uniform(k_coords, (n_cities, 2), dtype=jnp.float32)
    pop_keys = jax.random.split(k_pop, pop_size)
    genes = jax.vmap(lambda k: jax.random.permutation(k, n_cities))(pop_keys)
    genes = genes.astype(jnp.int32)                      # (pop_size, n_cities)

    new_genes, fitness = mutate_population(genes, coords, k_mut)
    jax.block_until_ready(fitness)

    # Pure-numpy reference check of the per-chromosome closed-tour length.
    g = np.asarray(new_genes)
    c = np.asarray(coords)
    ref = np.array(
        [np.sum(np.linalg.norm(c[row] - c[np.roll(row, -1)], axis=1)) for row in g],
        dtype=np.float32,
    )
    np.testing.assert_allclose(np.asarray(fitness), ref, rtol=1e-4, atol=1e-5)
    # Every gene is still a permutation after the swap mutation.
    assert all(sorted(row.tolist()) == list(range(n_cities)) for row in g)

    # Chromosome dataclass view kept for API fidelity (outside the hot path).
    best = int(np.argmin(np.asarray(fitness)))
    _ = Chromosome(gene=g[best].tolist(), phenome=float(fitness[best]))

    print("KERNEL_OK")
</pallas_src>

<mosaic_0001>
module attributes {stable_mosaic.version = 11 : i64} {
  func.func @_tour_fitness_kernel(%arg0: i32, %arg1: i32, %arg2: memref<16x128xf32, #tpu.memory_space<vmem>>, %arg3: memref<16x128xf32, #tpu.memory_space<vmem>>, %arg4: memref<1x128xf32, #tpu.memory_space<vmem>>, %arg5: memref<1x128xf32, #tpu.memory_space<vmem>>, %arg6: memref<1x128xf32, #tpu.memory_space<vmem>>, %arg7: memref<1x128xf32, #tpu.memory_space<vmem>>, %arg8: memref<1x128xf32, #tpu.memory_space<vmem>>, %arg9: memref<1x128xf32, #tpu.memory_space<vmem>>) attributes {dimension_semantics = [#tpu.dimension_semantics<parallel>, #tpu.dimension_semantics<arbitrary>], iteration_bounds = array<i64: 1, 1>, scalar_prefetch = 0 : i64, scratch_operands = 5 : i64, tpu.core_type = #tpu.core_type<tc>, window_params = [{transform_indices = @transform_0, window_bounds = array<i64: 16, 128>}, {transform_indices = @transform_1, window_bounds = array<i64: 16, 128>}, {transform_indices = @transform_2, window_bounds = array<i64: 1, 128>}]} {
    %c0 = arith.constant 0 : index
    %c0_0 = arith.constant 0 : index
    %0 = vector.load %arg2[%c0, %c0_0] : memref<16x128xf32, #tpu.memory_space<vmem>>, vector<16x128xf32>
    %c0_1 = arith.constant 0 : index
    %c0_2 = arith.constant 0 : index
    %1 = vector.load %arg3[%c0_1, %c0_2] : memref<16x128xf32, #tpu.memory_space<vmem>>, vector<16x128xf32>
    %c0_i32 = arith.constant 0 : i32
    %2 = arith.cmpi eq, %arg1, %c0_i32 : i32
    %3 = arith.extui %2 : i1 to i32
    %c0_i32_3 = arith.constant 0 : i32
    %4 = arith.cmpi ne, %3, %c0_i32_3 : i32
    scf.if %4 {
      %cst_19 = arith.constant 0.000000e+00 : f32
      %33 = vector.broadcast %cst_19 : f32 to vector<1x128xf32>
      %c0_20 = arith.constant 0 : index
      %c0_21 = arith.constant 0 : index
      %34 = vector.load %arg5[%c0_20, %c0_21] : memref<1x128xf32, #tpu.memory_space<vmem>>, vector<1x128xf32>
      tpu.vector_store %arg5[%c0_20, %c0_21], %33 {strides = array<i32>} : memref<1x128xf32, #tpu.memory_space<vmem>>, vector<1x128xf32>,
      %35 = vector.extract_strided_slice %0 {offsets = [0, 0], sizes = [1, 128], strides = [1, 1]} : vector<16x128xf32> to vector<1x128xf32>
      %c0_22 = arith.constant 0 : index
      %c0_23 = arith.constant 0 : index
      %36 = vector.load %arg8[%c0_22, %c0_23] : memref<1x128xf32, #tpu.memory_space<vmem>>, vector<1x128xf32>
      tpu.vector_store %arg8[%c0_22, %c0_23], %35 {strides = array<i32>} : memref<1x128xf32, #tpu.memory_space<vmem>>, vector<1x128xf32>,
      %37 = vector.extract_strided_slice %1 {offsets = [0, 0], sizes = [1, 128], strides = [1, 1]} : vector<16x128xf32> to vector<1x128xf32>
      %c0_24 = arith.constant 0 : index
      %c0_25 = arith.constant 0 : index
      %38 = vector.load %arg9[%c0_24, %c0_25] : memref<1x128xf32, #tpu.memory_space<vmem>>, vector<1x128xf32>
      tpu.vector_store %arg9[%c0_24, %c0_25], %37 {strides = array<i32>} : memref<1x128xf32, #tpu.memory_space<vmem>>, vector<1x128xf32>,
    } else {
    }
    %c0_i32_4 = arith.constant 0 : i32
    %5 = arith.cmpi sgt, %arg1, %c0_i32_4 : i32
    %6 = arith.extui %5 : i1 to i32
    %c0_i32_5 = arith.constant 0 : i32
    %7 = arith.cmpi ne, %6, %c0_i32_5 : i32
    scf.if %7 {
      %33 = vector.extract_strided_slice %0 {offsets = [0, 0], sizes = [1, 128], strides = [1, 1]} : vector<16x128xf32> to vector<1x128xf32>
      %c0_19 = arith.constant 0 : index
      %c0_20 = arith.constant 0 : index
      %34 = vector.load %arg6[%c0_19, %c0_20] : memref<1x128xf32, #tpu.memory_space<vmem>>, vector<1x128xf32>
      %35 = arith.subf %33, %34 : vector<1x128xf32>
      %36 = vector.extract_strided_slice %1 {offsets = [0, 0], sizes = [1, 128], strides = [1, 1]} : vector<16x128xf32> to vector<1x128xf32>
      %c0_21 = arith.constant 0 : index
      %c0_22 = arith.constant 0 : index
      %37 = vector.load %arg7[%c0_21, %c0_22] : memref<1x128xf32, #tpu.memory_space<vmem>>, vector<1x128xf32>
      %38 = arith.subf %36, %37 : vector<1x128xf32>
      %c0_23 = arith.constant 0 : index
      %c0_24 = arith.constant 0 : index
      %39 = vector.load %arg5[%c0_23, %c0_24] : memref<1x128xf32, #tpu.memory_space<vmem>>, vector<1x128xf32>
      %40 = arith.mulf %35, %35 : vector<1x128xf32>
      %41 = arith.mulf %38, %38 : vector<1x128xf32>
      %42 = arith.addf %40, %41 : vector<1x128xf32>
      %43 = math.sqrt %42 : vector<1x128xf32>
      %44 = arith.addf %39, %43 : vector<1x128xf32>
      %c0_25 = arith.constant 0 : index
      %c0_26 = arith.constant 0 : index
      %45 = vector.load %arg5[%c0_25, %c0_26] : memref<1x128xf32, #tpu.memory_space<vmem>>, vector<1x128xf32>
      tpu.vector_store %arg5[%c0_25, %c0_26], %44 {strides = array<i32>} : memref<1x128xf32, #tpu.memory_space<vmem>>, vector<1x128xf32>,
    } else {
    }
    %c1_i32 = arith.constant 1 : i32
    %8 = tpu.dynamic_rotate %0 by %c1_i32 dim 0 : vector<16x128xf32>, i32 -> vector<16x128xf32>
    %c1_i32_6 = arith.constant 1 : i32
    %9 = tpu.dynamic_rotate %1 by %c1_i32_6 dim 0 : vector<16x128xf32>, i32 -> vector<16x128xf32>
    %10 = arith.subf %0, %8 : vector<16x128xf32>
    %11 = arith.subf %1, %9 : vector<16x128xf32>
    %12 = arith.mulf %10, %10 : vector<16x128xf32>
    %13 = arith.mulf %11, %11 : vector<16x128xf32>
    %14 = arith.addf %12, %13 : vector<16x128xf32>
    %15 = math.sqrt %14 : vector<16x128xf32>
    %16 = tpu.iota {dimensions = array<i32: 0>} : vector<16x128xi32>
    %c0_i32_7 = arith.constant 0 : i32
    %17 = vector.broadcast %c0_i32_7 : i32 to vector<16x128xi32>
    %18 = arith.cmpi sgt, %16, %17 : vector<16x128xi32>
    %cst = arith.constant 0.000000e+00 : f32
    %19 = vector.broadcast %cst : f32 to vector<16x128xf32>
    %20 = arith.select %18, %15, %19 : vector<16x128xi1>, vector<16x128xf32>
    %c0_8 = arith.constant 0 : index
    %c0_9 = arith.constant 0 : index
    %21 = vector.load %arg5[%c0_8, %c0_9] : memref<1x128xf32, #tpu.memory_space<vmem>>, vector<1x128xf32>
    %cst_10 = arith.constant dense<0.000000e+00> : vector<128xf32>
    %22 = vector.multi_reduction <add>, %20, %cst_10 [0] : vector<16x128xf32> to vector<128xf32>
    %23 = vector.shape_cast %22 : vector<128xf32> to vector<1x128xf32>
    %24 = arith.addf %21, %23 : vector<1x128xf32>
    %c0_11 = arith.constant 0 : index
    %c0_12 = arith.constant 0 : index
    %25 = vector.load %arg5[%c0_11, %c0_12] : memref<1x128xf32, #tpu.memory_space<vmem>>, vector<1x128xf32>
    tpu.vector_store %arg5[%c0_11, %c0_12], %24 {strides = array<i32>} : memref<1x128xf32, #tpu.memory_space<vmem>>, vector<1x128xf32>,
    %26 = vector.extract_strided_slice %0 {offsets = [15, 0], sizes = [1, 128], strides = [1, 1]} : vector<16x128xf32> to vector<1x128xf32>
    %c0_13 = arith.constant 0 : index
    %c0_14 = arith.constant 0 : index
    %27 = vector.load %arg6[%c0_13, %c0_14] : memref<1x128xf32, #tpu.memory_space<vmem>>, vector<1x128xf32>
    tpu.vector_store %arg6[%c0_13, %c0_14], %26 {strides = array<i32>} : memref<1x128xf32, #tpu.memory_space<vmem>>, vector<1x128xf32>,
    %28 = vector.extract_strided_slice %1 {offsets = [15, 0], sizes = [1, 128], strides = [1, 1]} : vector<16x128xf32> to vector<1x128xf32>
    %c0_15 = arith.constant 0 : index
    %c0_16 = arith.constant 0 : index
    %29 = vector.load %arg7[%c0_15, %c0_16] : memref<1x128xf32, #tpu.memory_space<vmem>>, vector<1x128xf32>
    tpu.vector_store %arg7[%c0_15, %c0_16], %28 {strides = array<i32>} : memref<1x128xf32, #tpu.memory_space<vmem>>, vector<1x128xf32>,
    %c0_i32_17 = arith.constant 0 : i32
    %30 = arith.cmpi eq, %arg1, %c0_i32_17 : i32
    %31 = arith.extui %30 : i1 to i32
    %c0_i32_18 = arith.constant 0 : i32
    %32 = arith.cmpi ne, %31, %c0_i32_18 : i32
    scf.if %32 {
      %33 = vector.extract_strided_slice %0 {offsets = [15, 0], sizes = [1, 128], strides = [1, 1]} : vector<16x128xf32> to vector<1x128xf32>
      %c0_19 = arith.constant 0 : index
      %c0_20 = arith.constant 0 : index
      %34 = vector.load %arg8[%c0_19, %c0_20] : memref<1x128xf32, #tpu.memory_space<vmem>>, vector<1x128xf32>
      %35 = arith.subf %33, %34 : vector<1x128xf32>
      %36 = vector.extract_strided_slice %1 {offsets = [15, 0], sizes = [1, 128], strides = [1, 1]} : vector<16x128xf32> to vector<1x128xf32>
      %c0_21 = arith.constant 0 : index
      %c0_22 = arith.constant 0 : index
      %37 = vector.load %arg9[%c0_21, %c0_22] : memref<1x128xf32, #tpu.memory_space<vmem>>, vector<1x128xf32>
      %38 = arith.subf %36, %37 : vector<1x128xf32>
      %c0_23 = arith.constant 0 : index
      %c0_24 = arith.constant 0 : index
      %39 = vector.load %arg5[%c0_23, %c0_24] : memref<1x128xf32, #tpu.memory_space<vmem>>, vector<1x128xf32>
      %40 = arith.mulf %35, %35 : vector<1x128xf32>
      %41 = arith.mulf %38, %38 : vector<1x128xf32>
      %42 = arith.addf %40, %41 : vector<1x128xf32>
      %43 = math.sqrt %42 : vector<1x128xf32>
      %44 = arith.addf %39, %43 : vector<1x128xf32>
      %c0_25 = arith.constant 0 : index
      %c0_26 = arith.constant 0 : index
      %45 = vector.load %arg4[%c0_25, %c0_26] : memref<1x128xf32, #tpu.memory_space<vmem>>, vector<1x128xf32>
      tpu.vector_store %arg4[%c0_25, %c0_26], %44 {strides = array<i32>} : memref<1x128xf32, #tpu.memory_space<vmem>>, vector<1x128xf32>,
    } else {
    }
    return
  }
  func.func @transform_0(%arg0: i32, %arg1: i32) -> (i32, i32) {
    %c0_i32 = arith.constant 0 : i32
    return %arg1, %arg0 : i32, i32
  }
  func.func @transform_1(%arg0: i32, %arg1: i32) -> (i32, i32) {
    %c0_i32 = arith.constant 0 : i32
    return %arg1, %arg0 : i32, i32
  }
  func.func @transform_2(%arg0: i32, %arg1: i32) -> (i32, i32) {
    %c0_i32 = arith.constant 0 : i32
    %c0_i32_0 = arith.constant 0 : i32
    return %c0_i32, %arg0 : i32, i32
  }
}

</mosaic_0001>

<bundles_post_ra>
// kernel: mutate_population.1
= control target key start
LH: loop header
LB: loop body
LE: loop exit
PB: predicated region body
PF: predicated region fallthrough
CT: control target
= control target key end

     0   :  { %v45_v0 = vlaneseq  ;;  %v160_v4 = vmov 0.0   ;;  %v161_v42 = vmov 1966171168   ;;  %s192_s0 = inlined_call_operand.vmem [shape: f32[16,128], index: 0, kind: input, shape index: {}]   ;;  %s193_s1 = inlined_call_operand.vmem [shape: f32[16,128], index: 1, kind: input, shape index: {}]   ;;  %s194_s2 = inlined_call_operand.vmem [shape: f32[1,128], index: 2, kind: output, shape index: {}]  }
   0x1   :  { %v11_v1 = vld [vmem:[%s192_s0] sm:$0xff]  ;;  %v12_v2 = vld [vmem:[%s192_s0 + $0x8] sm:$0xff]  ;;  %19 = vst [vmem:[#allocation2] sm:$0x1] %v160_v4  ;;  %v128_v43 = vunpack.c.l.s4 %v161_v42 }
   0x2   :  { %v13_v3 = vld [vmem:[%s193_s1] sm:$0xff]  ;;  %20 = vst [vmem:[#allocation5] sm:$0x1] %v11_v1  ;;  %v43_v5 = vrot.slane %v11_v1, 7  ;;  %v44_v6 = vrot.slane %v12_v2, 7  ;;  %v46_v7 = vshrl.u32 %v45_v0, 7 }
   0x3   :  { %v14_v8 = vld [vmem:[%s193_s1 + $0x8] sm:$0xff]  ;;  %21 = vst [vmem:[#allocation6] sm:$0x1] %v13_v3  ;;  %v50_v9 = vrot.slane %v13_v3, 7  ;;  %v129_v51 = vunpack.c.0.s8 %v128_v43 }
   0x4   :  { %v51_v10 = vrot.slane %v14_v8, 7  ;;  %vm47_vm0 = vcmp.lt.s32.totalorder %v46_v7, 1  ;;  %vm79_vm5 = vcmp.gt.s32.totalorder %v46_v7, 0 }
   0x5   :  { %v48_v11 = vsel %vm47_vm0, %v43_v5, %v44_v6  ;;  %v49_v12 = vsel %vm47_vm0, %v44_v6, %v43_v5  ;;  %v132_v56 = vsub.s32 %v129_v51, %v46_v7 }
   0x6   :  { %v52_v13 = vsel %vm47_vm0, %v50_v9, %v51_v10  ;;  %v53_v14 = vsel %vm47_vm0, %v51_v10, %v50_v9  ;;  %v54_v15 = vsub.f32 %v11_v1, %v49_v12  ;;  %v55_v16 = vsub.f32 %v12_v2, %v48_v11 }
   0x7   :  { %v56_v17 = vsub.f32 %v13_v3, %v53_v14  ;;  %v57_v18 = vsub.f32 %v14_v8, %v52_v13 }
   0x8   :  { %v58_v19 = vmul.f32 %v54_v15, %v54_v15  ;;  %v59_v20 = vmul.f32 %v55_v16, %v55_v16  ;;  %v83_v60 = vld [vmem:[#allocation2] sm:$0x1] }
   0x9   :  { %v60_v21 = vmul.f32 %v56_v17, %v56_v17  ;;  %v61_v22 = vmul.f32 %v57_v18, %v57_v18  ;;  %v150_v23 = vld [vmem:[#allocation5] ss:$0 sm:$0xff] }
   0xa   :  { %v151_v24 = vld [vmem:[#allocation6] ss:$0 sm:$0xff]  ;;  %v105_v25 = vsub.f32 %v12_v2, %v150_v23 }
   0xb   :  { %v62_v26 = vadd.f32 %v60_v21, %v58_v19  ;;  %v63_v27 = vadd.f32 %v61_v22, %v59_v20  ;;  %v113_v28 = vsub.f32 %v14_v8, %v151_v24 }
   0xc   :  { %v115_v29 = vmul.f32 %v105_v25, %v105_v25 }
   0xd   :  { %154 = vrsqrt.f32 %v62_v26  ;;  %v116_v30 = vmul.f32 %v113_v28, %v113_v28  ;;  %vm66_vm1 = vcmp.eq.f32.partialorder %v62_v26, inf  ;;  %v69_v33 = vand.u32 2147483648, %v62_v26 }
   0xe   :  { %156 = vrsqrt.f32 %v63_v27  ;;  %vm68_vm2 = vcmp.eq.f32.partialorder %v62_v26, 0.0  ;;  %vm73_vm3 = vcmp.eq.f32.partialorder %v63_v27, inf  ;;  %v76_v36 = vand.u32 2147483648, %v63_v27 }
   0xf   :  { %v117_v31 = vadd.f32 %v116_v30, %v115_v29  ;;  %vm75_vm4 = vcmp.eq.f32.partialorder %v63_v27, 0.0 }
  0x11   :  { %158 = vrsqrt.f32 %v117_v31  ;;  %vm120_vm6 = vcmp.eq.f32.partialorder %v117_v31, inf  ;;  %v123_v49 = vand.u32 2147483648, %v117_v31  ;;  %vm122_vm7 = vcmp.eq.f32.partialorder %v117_v31, 0.0 }
  0x1a   :  { %v155_v32 = vpop.eup %154 }
  0x1b   :  { %v157_v34 = vpop.eup %156  ;;  %v65_v35 = vmul.f32 %v155_v32, %v62_v26 }
  0x1c   :  { %v72_v37 = vmul.f32 %v157_v34, %v63_v27 }
  0x1d   :  { %v67_v38 = vsel %vm66_vm1, %v62_v26, %v65_v35 }
  0x1e   :  { %v159_v39 = vpop.eup %158  ;;  %v70_v40 = vsel %vm68_vm2, %v69_v33, %v67_v38  ;;  %v74_v41 = vsel %vm73_vm3, %v63_v27, %v72_v37 }
  0x1f   :  { %v77_v44 = vsel %vm75_vm4, %v76_v36, %v74_v41  ;;  %v81_v45 = vsel %vm79_vm5, %v70_v40, 0.0  ;;  %v119_v46 = vmul.f32 %v159_v39, %v117_v31 }
  0x20   :  { %v84_v47 = vadd.f32 %v81_v45, %v77_v44 }
  0x21   :  { %v121_v48 = vsel %vm120_vm6, %v117_v31, %v119_v46 }
  0x22   :  { %v85_v50 = vrot.slane %v84_v47, 4  ;;  %v124_v52 = vsel %vm122_vm7, %v123_v49, %v121_v48 }
  0x23   :  { %v126_v55 = vcombine.high %v124_v52, %v124_v52 }
  0x24   :  { %v86_v53 = vadd.f32 %v85_v50, %v84_v47 }
  0x25   :  { %v133_v59 = vrot.slane %v126_v55, %v132_v56 }
  0x26   :  { %v87_v54 = vrot.slane %v86_v53, 2 }
  0x27   :  { %v134_v63 = vcombine.high %v133_v59, %v133_v59 }
  0x28   :  { %v88_v57 = vadd.f32 %v87_v54, %v86_v53 }
  0x29   :  { %v141_v0 = vrot.slane %v134_v63, %v132_v56 }
  0x2a   :  { %v89_v58 = vrot.slane %v88_v57, 1 }
  0x2b   :  { %v142_v1 = vcombine.high %v141_v0, %v141_v0 }
  0x2c   :  { %v90_v61 = vadd.f32 %v89_v58, %v88_v57 }
  0x2e   :  { %v91_v62 = vadd.f32 %v90_v61, %v83_v60 }
  0x30   :  { %92 = vst [vmem:[#allocation2] sm:$0x1] %v91_v62 }
  0x37   :  { %v114_v2 = vld [vmem:[#allocation2] sm:$0x1] }
  0x38   :  { %v144_v3 = vadd.f32 %v142_v1, %v114_v2 }
  0x3a   :  { %145 = vst [vmem:[%s194_s2] sm:$0x1] %v144_v3 }

</bundles_post_ra>
